<compile_context>
chip_gen: v5e
topology: v5e:2x2
jax: 0.10.0
libtpu: 0.0.40
codegen_flags: <defaults>
</compile_context>

<pallas_src>
import jax
import jax.numpy as jnp
from jax.experimental import pallas as pl
from jax.experimental.pallas import tpu as pltpu


# -----------------------------------------------------------------------------
# Fused Pallas kernel: encoders -> L x GINE layers -> mean pool -> decoder MLP
# -----------------------------------------------------------------------------
def _mpgnn_fused_kernel(
    src_ref, dst_ref, batch_ref,        # int32 [E,1], [1,E], [1,N]
    x_ref, ea_in_ref,                   # [N,Fn], [E,Fe]
    wn_ref, bn_ref,                     # node encoder   W:[Fn,H], b:[1,H]
    we_ref, be_ref,                     # edge encoder   W:[Fe,H], b:[1,H]
    wg_ref, bg_ref,                     # stacked GNN    W:[L,H,H], b:[L,1,H]
    wd1_ref, bd1_ref,                   # decoder 1      W:[H,H],  b:[1,H]
    wd2_ref, bd2_ref,                   # decoder 2      W:[H,O],  b:[1,O]
    o_ref,                              # output         [B, O]
    h_sc, ea_sc,                        # VMEM scratch   [N,H], [E,H]
):
    f32 = jnp.float32
    n_nodes, _ = h_sc.shape
    n_edges = ea_sc.shape[0]
    n_graphs = o_ref.shape[0]

    # ---- input / edge encoders (Linear), results stay in VMEM scratch ----
    h_sc[...] = (jnp.dot(x_ref[...], wn_ref[...], preferred_element_type=f32)
                 + bn_ref[...])
    ea_sc[...] = (jnp.dot(ea_in_ref[...], we_ref[...], preferred_element_type=f32)
                  + be_ref[...])
    ea = ea_sc[...]

    # ---- build gather / scatter / pool operators ONCE (loop-invariant) ----
    #   src_oh[e, n] = (n == src[e])   -> x_src = src_oh @ x    (row gather)
    #   dst_oh[n, e] = (n == dst[e])   -> aggr  = dst_oh @ msg  (scatter-add)
    #   pool  [g, n] = (g == batch[n]) -> sums  = pool   @ h    (segment sum)
    node_iota_en = jax.lax.broadcasted_iota(jnp.int32, (n_edges, n_nodes), 1)
    src_oh = (node_iota_en == src_ref[...]).astype(f32)
    node_iota_ne = jax.lax.broadcasted_iota(jnp.int32, (n_nodes, n_edges), 0)
    dst_oh = (node_iota_ne == dst_ref[...]).astype(f32)
    graph_iota = jax.lax.broadcasted_iota(jnp.int32, (n_graphs, n_nodes), 0)
    pool = (graph_iota == batch_ref[...]).astype(f32)

    # ---- message-passing layers (GINE-style, BN + residual fused) ----
    def layer(l, carry):
        x = h_sc[...]
        x_src = jnp.dot(src_oh, x, preferred_element_type=f32)           # [E,H]
        msg = jnp.maximum(x_src + ea, 0.0)
        aggr = jnp.dot(dst_oh, msg, preferred_element_type=f32)          # [N,H]
        z = jnp.dot(x + aggr, wg_ref[l], preferred_element_type=f32) + bg_ref[l]
        # BatchNorm1d over nodes (train-mode biased stats, gamma=1, beta=0),
        # single-pass statistics: var = E[z^2] - mean^2.
        mean = jnp.mean(z, axis=0, keepdims=True)
        var = jnp.mean(z * z, axis=0, keepdims=True) - mean * mean
        z = (z - mean) * jax.lax.rsqrt(var + 1e-5)
        z = jnp.maximum(z, 0.0)
        h_sc[...] = z + x                                                # residual
        return carry

    jax.lax.fori_loop(0, wg_ref.shape[0], layer, 0, unroll=True)

    # ---- graph-level mean pooling ----
    h = h_sc[...]
    sums = jnp.dot(pool, h, preferred_element_type=f32)                  # [B,H]
    cnt = jnp.sum(pool, axis=1, keepdims=True)                           # [B,1]
    pooled = sums * pl.reciprocal(jnp.maximum(cnt, 1.0), approx=True)

    # ---- output decoder: Linear + ReLU, Linear (no final activation) ----
    g = jnp.maximum(
        jnp.dot(pooled, wd1_ref[...], preferred_element_type=f32) + bd1_ref[...],
        0.0)
    out = jnp.dot(g, wd2_ref[...], preferred_element_type=f32) + bd2_ref[...]
    o_ref[...] = out.astype(o_ref.dtype)


# -----------------------------------------------------------------------------
# Wrapper: one pallas_call for the entire forward
# -----------------------------------------------------------------------------
_VMEM = pl.BlockSpec(memory_space=pltpu.MemorySpace.VMEM)


def mpgnn_forward(params, x, edge_index, edge_attr, batch, num_graphs):
    n_nodes = x.shape[0]
    n_edges = edge_attr.shape[0]
    nhid = params["node_enc"][0].shape[1]
    nout = params["dec2"][0].shape[1]

    # Tiny int32 index vectors (no one-hot / transpose materialized in HBM).
    src_ids = edge_index[0].astype(jnp.int32).reshape(n_edges, 1)
    dst_ids = edge_index[1].astype(jnp.int32).reshape(1, n_edges)
    batch_ids = batch.astype(jnp.int32).reshape(1, n_nodes)

    # Stack per-layer GNN weights so the kernel loops over them in VMEM.
    wg = jnp.stack([w for w, _ in params["gnn"]])      # [L, H, H]
    bg = jnp.stack([b for _, b in params["gnn"]])      # [L, 1, H]

    fused = pl.pallas_call(
        _mpgnn_fused_kernel,
        out_shape=jax.ShapeDtypeStruct((num_graphs, nout), jnp.float32),
        in_specs=[_VMEM] * 15,
        out_specs=_VMEM,
        scratch_shapes=[
            pltpu.VMEM((n_nodes, nhid), jnp.float32),   # h  (node features)
            pltpu.VMEM((n_edges, nhid), jnp.float32),   # ea (encoded edges)
        ],
    )
    return fused(
        src_ids, dst_ids, batch_ids, x, edge_attr,
        params["node_enc"][0], params["node_enc"][1],
        params["edge_enc"][0], params["edge_enc"][1],
        wg, bg,
        params["dec1"][0], params["dec1"][1],
        params["dec2"][0], params["dec2"][1],
    )


# -----------------------------------------------------------------------------
# Parameter init
# -----------------------------------------------------------------------------
def init_params(key, nfeat_node, nfeat_edge, nhid, nout, nlayer_gnn):
    def dense(k, fan_in, fan_out):
        kw, _ = jax.random.split(k)
        scale = 1.0 / jnp.sqrt(jnp.float32(fan_in))
        w = jax.random.uniform(kw, (fan_in, fan_out), jnp.float32, -scale, scale)
        b = jnp.zeros((1, fan_out), jnp.float32)
        return w, b

    keys = jax.random.split(key, 4 + nlayer_gnn)
    return {
        "node_enc": dense(keys[0], nfeat_node, nhid),
        "edge_enc": dense(keys[1], nfeat_edge, nhid),
        "gnn": [dense(keys[2 + i], nhid, nhid) for i in range(nlayer_gnn)],
        "dec1": dense(keys[2 + nlayer_gnn], nhid, nhid),
        "dec2": dense(keys[3 + nlayer_gnn], nhid, nout),
    }


# -----------------------------------------------------------------------------
# Demo
# -----------------------------------------------------------------------------
if __name__ == "__main__":
    NFEAT_NODE = 4
    NFEAT_EDGE = 4
    NHID = 32
    NOUT = 8
    NLAYER_GNN = 2
    N_NODES = 16
    N_EDGES = 32
    N_GRAPHS = 2

    key = jax.random.PRNGKey(0)
    k_param, k_x, k_ea, k_src, k_dst = jax.random.split(key, 5)

    params = init_params(k_param, NFEAT_NODE, NFEAT_EDGE, NHID, NOUT, NLAYER_GNN)

    x = jax.random.normal(k_x, (N_NODES, NFEAT_NODE), jnp.float32)
    edge_attr = jax.random.normal(k_ea, (N_EDGES, NFEAT_EDGE), jnp.float32)
    src = jax.random.randint(k_src, (N_EDGES,), 0, N_NODES, jnp.int32)
    dst = jax.random.randint(k_dst, (N_EDGES,), 0, N_NODES, jnp.int32)
    edge_index = jnp.stack([src, dst], axis=0)                      # [2, E]
    batch = jnp.concatenate([
        jnp.zeros((N_NODES // 2,), jnp.int32),
        jnp.ones((N_NODES - N_NODES // 2,), jnp.int32),
    ])                                                              # [N]

    fwd = jax.jit(mpgnn_forward, static_argnums=(5,))
    out = fwd(params, x, edge_index, edge_attr, batch, N_GRAPHS)
    jax.block_until_ready(out)
    assert out.shape == (N_GRAPHS, NOUT)
    print("KERNEL_OK")
</pallas_src>

<mosaic_0001>
module attributes {stable_mosaic.version = 11 : i64} {
  func.func @_mpgnn_fused_kernel(%arg0: memref<32x1xi32, #tpu.memory_space<vmem>>, %arg1: memref<1x32xi32, #tpu.memory_space<vmem>>, %arg2: memref<1x16xi32, #tpu.memory_space<vmem>>, %arg3: memref<16x4xf32, #tpu.memory_space<vmem>>, %arg4: memref<32x4xf32, #tpu.memory_space<vmem>>, %arg5: memref<4x32xf32, #tpu.memory_space<vmem>>, %arg6: memref<1x32xf32, #tpu.memory_space<vmem>>, %arg7: memref<4x32xf32, #tpu.memory_space<vmem>>, %arg8: memref<1x32xf32, #tpu.memory_space<vmem>>, %arg9: memref<2x32x32xf32, #tpu.memory_space<vmem>>, %arg10: memref<2x1x32xf32, #tpu.memory_space<vmem>>, %arg11: memref<32x32xf32, #tpu.memory_space<vmem>>, %arg12: memref<1x32xf32, #tpu.memory_space<vmem>>, %arg13: memref<32x8xf32, #tpu.memory_space<vmem>>, %arg14: memref<1x8xf32, #tpu.memory_space<vmem>>, %arg15: memref<2x8xf32, #tpu.memory_space<vmem>>, %arg16: memref<16x32xf32, #tpu.memory_space<vmem>>, %arg17: memref<32x32xf32, #tpu.memory_space<vmem>>) attributes {dimension_semantics = [], scalar_prefetch = 0 : i64, scratch_operands = 2 : i64, tpu.core_type = #tpu.core_type<tc>} {
    %c0 = arith.constant 0 : index
    %c0_0 = arith.constant 0 : index
    %0 = vector.load %arg3[%c0, %c0_0] : memref<16x4xf32, #tpu.memory_space<vmem>>, vector<16x4xf32>
    %c0_1 = arith.constant 0 : index
    %c0_2 = arith.constant 0 : index
    %1 = vector.load %arg5[%c0_1, %c0_2] : memref<4x32xf32, #tpu.memory_space<vmem>>, vector<4x32xf32>
    %cst = arith.constant dense<0.000000e+00> : vector<16x32xf32>
    %2 = tpu.matmul %0, %1, %cst {dimension_numbers = #tpu.dot_dimension_numbers<[1], [0], [0], [1], [0, 0, 1, 1], [], []>} : vector<16x4xf32>, vector<4x32xf32>, vector<16x32xf32> -> vector<16x32xf32>
    %c0_3 = arith.constant 0 : index
    %c0_4 = arith.constant 0 : index
    %3 = vector.load %arg6[%c0_3, %c0_4] : memref<1x32xf32, #tpu.memory_space<vmem>>, vector<1x32xf32>
    %4 = vector.broadcast %3 : vector<1x32xf32> to vector<16x32xf32>
    %5 = arith.addf %2, %4 : vector<16x32xf32>
    %c0_5 = arith.constant 0 : index
    %c0_6 = arith.constant 0 : index
    %6 = vector.load %arg16[%c0_5, %c0_6] : memref<16x32xf32, #tpu.memory_space<vmem>>, vector<16x32xf32>
    tpu.vector_store %arg16[%c0_5, %c0_6], %5 {strides = array<i32>} : memref<16x32xf32, #tpu.memory_space<vmem>>, vector<16x32xf32>,
    %c0_7 = arith.constant 0 : index
    %c0_8 = arith.constant 0 : index
    %7 = vector.load %arg4[%c0_7, %c0_8] : memref<32x4xf32, #tpu.memory_space<vmem>>, vector<32x4xf32>
    %c0_9 = arith.constant 0 : index
    %c0_10 = arith.constant 0 : index
    %8 = vector.load %arg7[%c0_9, %c0_10] : memref<4x32xf32, #tpu.memory_space<vmem>>, vector<4x32xf32>
    %cst_11 = arith.constant dense<0.000000e+00> : vector<32x32xf32>
    %9 = tpu.matmul %7, %8, %cst_11 {dimension_numbers = #tpu.dot_dimension_numbers<[1], [0], [0], [1], [0, 0, 1, 1], [], []>} : vector<32x4xf32>, vector<4x32xf32>, vector<32x32xf32> -> vector<32x32xf32>
    %c0_12 = arith.constant 0 : index
    %c0_13 = arith.constant 0 : index
    %10 = vector.load %arg8[%c0_12, %c0_13] : memref<1x32xf32, #tpu.memory_space<vmem>>, vector<1x32xf32>
    %11 = vector.broadcast %10 : vector<1x32xf32> to vector<32x32xf32>
    %12 = arith.addf %9, %11 : vector<32x32xf32>
    %c0_14 = arith.constant 0 : index
    %c0_15 = arith.constant 0 : index
    %13 = vector.load %arg17[%c0_14, %c0_15] : memref<32x32xf32, #tpu.memory_space<vmem>>, vector<32x32xf32>
    tpu.vector_store %arg17[%c0_14, %c0_15], %12 {strides = array<i32>} : memref<32x32xf32, #tpu.memory_space<vmem>>, vector<32x32xf32>,
    %c0_16 = arith.constant 0 : index
    %c0_17 = arith.constant 0 : index
    %14 = vector.load %arg17[%c0_16, %c0_17] : memref<32x32xf32, #tpu.memory_space<vmem>>, vector<32x32xf32>
    %15 = tpu.iota {dimensions = array<i32: 1>} : vector<32x16xi32>
    %c0_18 = arith.constant 0 : index
    %c0_19 = arith.constant 0 : index
    %16 = vector.load %arg0[%c0_18, %c0_19] : memref<32x1xi32, #tpu.memory_space<vmem>>, vector<32x1xi32>
    %17 = vector.broadcast %16 : vector<32x1xi32> to vector<32x16xi32>
    %18 = arith.cmpi eq, %15, %17 : vector<32x16xi32>
    %19 = arith.extui %18 : vector<32x16xi1> to vector<32x16xi32>
    %20 = arith.sitofp %19 : vector<32x16xi32> to vector<32x16xf32>
    %21 = tpu.iota {dimensions = array<i32: 0>} : vector<16x32xi32>
    %c0_20 = arith.constant 0 : index
    %c0_21 = arith.constant 0 : index
    %22 = vector.load %arg1[%c0_20, %c0_21] : memref<1x32xi32, #tpu.memory_space<vmem>>, vector<1x32xi32>
    %23 = vector.broadcast %22 : vector<1x32xi32> to vector<16x32xi32>
    %24 = arith.cmpi eq, %21, %23 : vector<16x32xi32>
    %25 = arith.extui %24 : vector<16x32xi1> to vector<16x32xi32>
    %26 = arith.sitofp %25 : vector<16x32xi32> to vector<16x32xf32>
    %27 = tpu.iota {dimensions = array<i32: 0>} : vector<2x16xi32>
    %c0_22 = arith.constant 0 : index
    %c0_23 = arith.constant 0 : index
    %28 = vector.load %arg2[%c0_22, %c0_23] : memref<1x16xi32, #tpu.memory_space<vmem>>, vector<1x16xi32>
    %29 = vector.broadcast %28 : vector<1x16xi32> to vector<2x16xi32>
    %30 = arith.cmpi eq, %27, %29 : vector<2x16xi32>
    %31 = arith.extui %30 : vector<2x16xi1> to vector<2x16xi32>
    %32 = arith.sitofp %31 : vector<2x16xi32> to vector<2x16xf32>
    %c0_i32 = arith.constant 0 : i32
    %c0_24 = arith.constant 0 : index
    %c0_25 = arith.constant 0 : index
    %33 = vector.load %arg16[%c0_24, %c0_25] : memref<16x32xf32, #tpu.memory_space<vmem>>, vector<16x32xf32>
    %cst_26 = arith.constant dense<0.000000e+00> : vector<32x32xf32>
    %34 = tpu.matmul %20, %33, %cst_26 {dimension_numbers = #tpu.dot_dimension_numbers<[1], [0], [0], [1], [0, 0, 1, 1], [], []>} : vector<32x16xf32>, vector<16x32xf32>, vector<32x32xf32> -> vector<32x32xf32>
    %35 = arith.addf %34, %14 : vector<32x32xf32>
    %cst_27 = arith.constant 0.000000e+00 : f32
    %36 = vector.broadcast %cst_27 : f32 to vector<32x32xf32>
    %37 = arith.maximumf %35, %36 : vector<32x32xf32>
    %cst_28 = arith.constant dense<0.000000e+00> : vector<16x32xf32>
    %38 = tpu.matmul %26, %37, %cst_28 {dimension_numbers = #tpu.dot_dimension_numbers<[1], [0], [0], [1], [0, 0, 1, 1], [], []>} : vector<16x32xf32>, vector<32x32xf32>, vector<16x32xf32> -> vector<16x32xf32>
    %39 = arith.addf %33, %38 : vector<16x32xf32>
    %40 = arith.index_cast %c0_i32 : i32 to index
    %c0_29 = arith.constant 0 : index
    %c0_30 = arith.constant 0 : index
    %41 = vector.load %arg9[%40, %c0_29, %c0_30] : memref<2x32x32xf32, #tpu.memory_space<vmem>>, vector<1x32x32xf32>
    %42 = vector.shape_cast %41 : vector<1x32x32xf32> to vector<32x32xf32>
    %cst_31 = arith.constant dense<0.000000e+00> : vector<16x32xf32>
    %43 = tpu.matmul %39, %42, %cst_31 {dimension_numbers = #tpu.dot_dimension_numbers<[1], [0], [0], [1], [0, 0, 1, 1], [], []>} : vector<16x32xf32>, vector<32x32xf32>, vector<16x32xf32> -> vector<16x32xf32>
    %44 = arith.index_cast %c0_i32 : i32 to index
    %c0_32 = arith.constant 0 : index
    %c0_33 = arith.constant 0 : index
    %45 = vector.load %arg10[%44, %c0_32, %c0_33] : memref<2x1x32xf32, #tpu.memory_space<vmem>>, vector<1x1x32xf32>
    %46 = vector.shape_cast %45 : vector<1x1x32xf32> to vector<1x32xf32>
    %47 = vector.broadcast %46 : vector<1x32xf32> to vector<16x32xf32>
    %48 = arith.addf %43, %47 : vector<16x32xf32>
    %cst_34 = arith.constant dense<0.000000e+00> : vector<32xf32>
    %49 = vector.multi_reduction <add>, %48, %cst_34 [0] : vector<16x32xf32> to vector<32xf32>
    %50 = vector.shape_cast %49 : vector<32xf32> to vector<1x32xf32>
    %cst_35 = arith.constant 1.600000e+01 : f32
    %51 = vector.broadcast %cst_35 : f32 to vector<1x32xf32>
    %52 = arith.divf %50, %51 : vector<1x32xf32>
    %53 = arith.mulf %48, %48 : vector<16x32xf32>
    %cst_36 = arith.constant dense<0.000000e+00> : vector<32xf32>
    %54 = vector.multi_reduction <add>, %53, %cst_36 [0] : vector<16x32xf32> to vector<32xf32>
    %55 = vector.shape_cast %54 : vector<32xf32> to vector<1x32xf32>
    %cst_37 = arith.constant 1.600000e+01 : f32
    %56 = vector.broadcast %cst_37 : f32 to vector<1x32xf32>
    %57 = arith.divf %55, %56 : vector<1x32xf32>
    %58 = arith.mulf %52, %52 : vector<1x32xf32>
    %59 = arith.subf %57, %58 : vector<1x32xf32>
    %60 = vector.broadcast %52 : vector<1x32xf32> to vector<16x32xf32>
    %61 = arith.subf %48, %60 : vector<16x32xf32>
    %cst_38 = arith.constant 9.99999974E-6 : f32
    %62 = vector.broadcast %cst_38 : f32 to vector<1x32xf32>
    %63 = arith.addf %59, %62 : vector<1x32xf32>
    %64 = math.rsqrt %63 : vector<1x32xf32>
    %65 = vector.broadcast %64 : vector<1x32xf32> to vector<16x32xf32>
    %66 = arith.mulf %61, %65 : vector<16x32xf32>
    %cst_39 = arith.constant 0.000000e+00 : f32
    %67 = vector.broadcast %cst_39 : f32 to vector<16x32xf32>
    %68 = arith.maximumf %66, %67 : vector<16x32xf32>
    %69 = arith.addf %68, %33 : vector<16x32xf32>
    %c0_40 = arith.constant 0 : index
    %c0_41 = arith.constant 0 : index
    %70 = vector.load %arg16[%c0_40, %c0_41] : memref<16x32xf32, #tpu.memory_space<vmem>>, vector<16x32xf32>
    tpu.vector_store %arg16[%c0_40, %c0_41], %69 {strides = array<i32>} : memref<16x32xf32, #tpu.memory_space<vmem>>, vector<16x32xf32>,
    %c1_i32 = arith.constant 1 : i32
    %c0_42 = arith.constant 0 : index
    %c0_43 = arith.constant 0 : index
    %71 = vector.load %arg16[%c0_42, %c0_43] : memref<16x32xf32, #tpu.memory_space<vmem>>, vector<16x32xf32>
    %cst_44 = arith.constant dense<0.000000e+00> : vector<32x32xf32>
    %72 = tpu.matmul %20, %71, %cst_44 {dimension_numbers = #tpu.dot_dimension_numbers<[1], [0], [0], [1], [0, 0, 1, 1], [], []>} : vector<32x16xf32>, vector<16x32xf32>, vector<32x32xf32> -> vector<32x32xf32>
    %73 = arith.addf %72, %14 : vector<32x32xf32>
    %cst_45 = arith.constant 0.000000e+00 : f32
    %74 = vector.broadcast %cst_45 : f32 to vector<32x32xf32>
    %75 = arith.maximumf %73, %74 : vector<32x32xf32>
    %cst_46 = arith.constant dense<0.000000e+00> : vector<16x32xf32>
    %76 = tpu.matmul %26, %75, %cst_46 {dimension_numbers = #tpu.dot_dimension_numbers<[1], [0], [0], [1], [0, 0, 1, 1], [], []>} : vector<16x32xf32>, vector<32x32xf32>, vector<16x32xf32> -> vector<16x32xf32>
    %77 = arith.addf %71, %76 : vector<16x32xf32>
    %78 = arith.index_cast %c1_i32 : i32 to index
    %c0_47 = arith.constant 0 : index
    %c0_48 = arith.constant 0 : index
    %79 = vector.load %arg9[%78, %c0_47, %c0_48] : memref<2x32x32xf32, #tpu.memory_space<vmem>>, vector<1x32x32xf32>
    %80 = vector.shape_cast %79 : vector<1x32x32xf32> to vector<32x32xf32>
    %cst_49 = arith.constant dense<0.000000e+00> : vector<16x32xf32>
    %81 = tpu.matmul %77, %80, %cst_49 {dimension_numbers = #tpu.dot_dimension_numbers<[1], [0], [0], [1], [0, 0, 1, 1], [], []>} : vector<16x32xf32>, vector<32x32xf32>, vector<16x32xf32> -> vector<16x32xf32>
    %82 = arith.index_cast %c1_i32 : i32 to index
    %c0_50 = arith.constant 0 : index
    %c0_51 = arith.constant 0 : index
    %83 = vector.load %arg10[%82, %c0_50, %c0_51] : memref<2x1x32xf32, #tpu.memory_space<vmem>>, vector<1x1x32xf32>
    %84 = vector.shape_cast %83 : vector<1x1x32xf32> to vector<1x32xf32>
    %85 = vector.broadcast %84 : vector<1x32xf32> to vector<16x32xf32>
    %86 = arith.addf %81, %85 : vector<16x32xf32>
    %cst_52 = arith.constant dense<0.000000e+00> : vector<32xf32>
    %87 = vector.multi_reduction <add>, %86, %cst_52 [0] : vector<16x32xf32> to vector<32xf32>
    %88 = vector.shape_cast %87 : vector<32xf32> to vector<1x32xf32>
    %cst_53 = arith.constant 1.600000e+01 : f32
    %89 = vector.broadcast %cst_53 : f32 to vector<1x32xf32>
    %90 = arith.divf %88, %89 : vector<1x32xf32>
    %91 = arith.mulf %86, %86 : vector<16x32xf32>
    %cst_54 = arith.constant dense<0.000000e+00> : vector<32xf32>
    %92 = vector.multi_reduction <add>, %91, %cst_54 [0] : vector<16x32xf32> to vector<32xf32>
    %93 = vector.shape_cast %92 : vector<32xf32> to vector<1x32xf32>
    %cst_55 = arith.constant 1.600000e+01 : f32
    %94 = vector.broadcast %cst_55 : f32 to vector<1x32xf32>
    %95 = arith.divf %93, %94 : vector<1x32xf32>
    %96 = arith.mulf %90, %90 : vector<1x32xf32>
    %97 = arith.subf %95, %96 : vector<1x32xf32>
    %98 = vector.broadcast %90 : vector<1x32xf32> to vector<16x32xf32>
    %99 = arith.subf %86, %98 : vector<16x32xf32>
    %cst_56 = arith.constant 9.99999974E-6 : f32
    %100 = vector.broadcast %cst_56 : f32 to vector<1x32xf32>
    %101 = arith.addf %97, %100 : vector<1x32xf32>
    %102 = math.rsqrt %101 : vector<1x32xf32>
    %103 = vector.broadcast %102 : vector<1x32xf32> to vector<16x32xf32>
    %104 = arith.mulf %99, %103 : vector<16x32xf32>
    %cst_57 = arith.constant 0.000000e+00 : f32
    %105 = vector.broadcast %cst_57 : f32 to vector<16x32xf32>
    %106 = arith.maximumf %104, %105 : vector<16x32xf32>
    %107 = arith.addf %106, %71 : vector<16x32xf32>
    %c0_58 = arith.constant 0 : index
    %c0_59 = arith.constant 0 : index
    %108 = vector.load %arg16[%c0_58, %c0_59] : memref<16x32xf32, #tpu.memory_space<vmem>>, vector<16x32xf32>
    tpu.vector_store %arg16[%c0_58, %c0_59], %107 {strides = array<i32>} : memref<16x32xf32, #tpu.memory_space<vmem>>, vector<16x32xf32>,
    %c2_i32 = arith.constant 2 : i32
    %c0_60 = arith.constant 0 : index
    %c0_61 = arith.constant 0 : index
    %109 = vector.load %arg16[%c0_60, %c0_61] : memref<16x32xf32, #tpu.memory_space<vmem>>, vector<16x32xf32>
    %cst_62 = arith.constant dense<0.000000e+00> : vector<2x32xf32>
    %110 = tpu.matmul %32, %109, %cst_62 {dimension_numbers = #tpu.dot_dimension_numbers<[1], [0], [0], [1], [0, 0, 1, 1], [], []>} : vector<2x16xf32>, vector<16x32xf32>, vector<2x32xf32> -> vector<2x32xf32>
    %cst_63 = arith.constant dense<0.000000e+00> : vector<2xf32>
    %111 = vector.multi_reduction <add>, %32, %cst_63 [1] : vector<2x16xf32> to vector<2xf32>
    %112 = vector.shape_cast %111 : vector<2xf32> to vector<2x1xf32>
    %cst_64 = arith.constant 1.000000e+00 : f32
    %113 = vector.broadcast %cst_64 : f32 to vector<2x1xf32>
    %114 = arith.maximumf %112, %113 : vector<2x1xf32>
    %115 = tpu.reciprocal %114 {approx = true} : vector<2x1xf32> -> vector<2x1xf32>
    %116 = vector.broadcast %115 : vector<2x1xf32> to vector<2x32xf32>
    %117 = arith.mulf %110, %116 : vector<2x32xf32>
    %c0_65 = arith.constant 0 : index
    %c0_66 = arith.constant 0 : index
    %118 = vector.load %arg11[%c0_65, %c0_66] : memref<32x32xf32, #tpu.memory_space<vmem>>, vector<32x32xf32>
    %cst_67 = arith.constant dense<0.000000e+00> : vector<2x32xf32>
    %119 = tpu.matmul %117, %118, %cst_67 {dimension_numbers = #tpu.dot_dimension_numbers<[1], [0], [0], [1], [0, 0, 1, 1], [], []>} : vector<2x32xf32>, vector<32x32xf32>, vector<2x32xf32> -> vector<2x32xf32>
    %c0_68 = arith.constant 0 : index
    %c0_69 = arith.constant 0 : index
    %120 = vector.load %arg12[%c0_68, %c0_69] : memref<1x32xf32, #tpu.memory_space<vmem>>, vector<1x32xf32>
    %121 = vector.broadcast %120 : vector<1x32xf32> to vector<2x32xf32>
    %122 = arith.addf %119, %121 : vector<2x32xf32>
    %cst_70 = arith.constant 0.000000e+00 : f32
    %123 = vector.broadcast %cst_70 : f32 to vector<2x32xf32>
    %124 = arith.maximumf %122, %123 : vector<2x32xf32>
    %c0_71 = arith.constant 0 : index
    %c0_72 = arith.constant 0 : index
    %125 = vector.load %arg13[%c0_71, %c0_72] : memref<32x8xf32, #tpu.memory_space<vmem>>, vector<32x8xf32>
    %cst_73 = arith.constant dense<0.000000e+00> : vector<2x8xf32>
    %126 = tpu.matmul %124, %125, %cst_73 {dimension_numbers = #tpu.dot_dimension_numbers<[1], [0], [0], [1], [0, 0, 1, 1], [], []>} : vector<2x32xf32>, vector<32x8xf32>, vector<2x8xf32> -> vector<2x8xf32>
    %c0_74 = arith.constant 0 : index
    %c0_75 = arith.constant 0 : index
    %127 = vector.load %arg14[%c0_74, %c0_75] : memref<1x8xf32, #tpu.memory_space<vmem>>, vector<1x8xf32>
    %128 = vector.broadcast %127 : vector<1x8xf32> to vector<2x8xf32>
    %129 = arith.addf %126, %128 : vector<2x8xf32>
    %c0_76 = arith.constant 0 : index
    %c0_77 = arith.constant 0 : index
    %130 = vector.load %arg15[%c0_76, %c0_77] : memref<2x8xf32, #tpu.memory_space<vmem>>, vector<2x8xf32>
    tpu.vector_store %arg15[%c0_76, %c0_77], %129 {strides = array<i32>} : memref<2x8xf32, #tpu.memory_space<vmem>>, vector<2x8xf32>,
    return
  }
}

</mosaic_0001>

<bundles_post_ra>
// kernel: mpgnn_forward.1
= control target key start
LH: loop header
LB: loop body
LE: loop exit
PB: predicated region body
PF: predicated region fallthrough
CT: control target
= control target key end

     0   :  { %vm65_vm0 = vcmask 1043456   ;;  %vm58_vm1 = vcmask 31744   ;;  %v714_v4 = vmov 0   ;;  %s1032_s0 = inlined_call_operand.vmem [shape: s32[32,1], index: 0, kind: input, shape index: {}]   ;;  %s1033_s1 = inlined_call_operand.vmem [shape: s32[1,32], index: 1, kind: input, shape index: {}]   ;;  %s1034_s2 = inlined_call_operand.vmem [shape: s32[1,16], index: 2, kind: input, shape index: {}]   ;;  %s1035_s3 = inlined_call_operand.vmem [shape: f32[16,4], index: 3, kind: input, shape index: {}]   ;;  %s1036_s4 = inlined_call_operand.vmem [shape: f32[32,4], index: 4, kind: input, shape index: {}]   ;;  %s1037_s5 = inlined_call_operand.vmem [shape: f32[4,32], index: 5, kind: input, shape index: {}]   ;;  %s1038_s6 = inlined_call_operand.vmem [shape: f32[1,32], index: 6, kind: input, shape index: {}]   ;;  %s1039_s7 = inlined_call_operand.vmem [shape: f32[4,32], index: 7, kind: input, shape index: {}]   ;;  %s1040_s8 = inlined_call_operand.vmem [shape: f32[1,32], index: 8, kind: input, shape index: {}]   ;;  %s1041_s9 = inlined_call_operand.vmem [shape: f32[2,32,32], index: 9, kind: input, shape index: {}]   ;;  %s1042_s10 = inlined_call_operand.vmem [shape: f32[2,1,32], index: 10, kind: input, shape index: {}]   ;;  %s1043_s11 = inlined_call_operand.vmem [shape: f32[32,32], index: 11, kind: input, shape index: {}]   ;;  %s1044_s12 = inlined_call_operand.vmem [shape: f32[1,32], index: 12, kind: input, shape index: {}]   ;;  %s1045_s13 = inlined_call_operand.vmem [shape: f32[32,8], index: 13, kind: input, shape index: {}]   ;;  %s1046_s14 = inlined_call_operand.vmem [shape: f32[1,8], index: 14, kind: input, shape index: {}]   ;;  %s1047_s15 = inlined_call_operand.hbm [shape: f32[2,8], index: 15, kind: output, shape index: {}]  }
   0x1   :  { %v53_v0 = vld [vmem:[%s1037_s5] sm:$0xf]  ;;  %v160_v3 = vld [vmem:[%s1032_s0 + $0x10] sm:$0xff]  ;;  %670 = vset.pattern.permute.xlu0 %v714_v4  ;;  %671 = vset.pattern.permute.xlu1 %v714_v4 }
   0x2   :  { %v51_v1 = vld [vmem:[%s1035_s3] sm:$0xff]  ;;  %627 = vmatpush.msk.msra.mxu0 %vm65_vm0, %v53_v0  ;;  %169 = vperm.xlu1 %671, %v160_v3  }
   0x3   :  { %v158_v2 = vld [vmem:[%s1032_s0] sm:$0xff]  ;;  %628 = vmatmul.msk.f32.vlgmr.msra.gmra.mxu0 %vm58_vm1, %v51_v1 }
   0x4   :  { %163 = vperm.xlu0 %670, %v158_v2  }
   0x5   :  { %20 = vsyncpa [#allocation5], 0  ;;  %v52_v5 = vld [vmem:[%s1035_s3 + $0x8] sm:$0xff]  ;;  %v161_v7 = vld [vmem:[%s1032_s0 + $0x18] sm:$0xff]  ;;  %vm92_vm2 = vcmask 261120   ;;  %v156_v17 = vlaneseq  ;;  %v715_v22 = vmov 0.0  }
   0x6   :  { %v159_v6 = vld [vmem:[%s1032_s0 + $0x8] sm:$0xff]  ;;  %v99_v8 = vld [vmem:[%s1039_s7] sm:$0xf]  ;;  %v97_v12 = vld [vmem:[%s1036_s4 + $0x10] sm:$0xff]  ;;  %vm204_vm4 = vcmask 130048   ;;  %vm539_vm15 = vcmask 123904  }
   0x7   :  { %v95_v9 = vld [vmem:[%s1036_s4] sm:$0xff]  ;;  %630 = vmatpush.msk.msra.mxu1 %vm65_vm0, %v99_v8  ;;  %v96_v10 = vld [vmem:[%s1036_s4 + $0x8] sm:$0xff]  ;;  %v98_v15 = vld [vmem:[%s1036_s4 + $0x18] sm:$0xff]  ;;  %v157_v19 = vand.u32 127, %v156_v17  ;;  %v896_v52 = vshrl.u32 %v156_v17, 7  ;;  %s717_s22 = smov [#allocation4]  }
   0x8   :  { %631 = vmatmul.msk.f32.vlgmr.msra.gmra.mxu1 %vm58_vm1, %v95_v9  ;;  %v672_v11 = vld [vmem:[%s1038_s6] ss:$0 sm:$0xff]  ;;  %v284_v42 = vld [vmem:[%s1041_s9 + $0x18] sm:$0xff]  ;;  %v283_v43 = vld [vmem:[%s1041_s9 + $0x10] sm:$0xff]  ;;  %s616_s7 = sshll.u32 %s717_s22, 4  ;;  %s617_s7 = int_to_ptr.vmem [resolvable:$true] %s616_s7 }
   0x9   :  { %v673_v31 = vld [vmem:[%s1040_s8] ss:$0 sm:$0xff]  ;;  %307 = vmatpush.msrb.mxu0 %v284_v42  ;;  %v188_v61 = vadd.s32 8, %v896_v52  ;;  %v282_v63 = vld [vmem:[%s1041_s9 + $0x8] sm:$0xff] }
   0xa   :  { %172 = vperm.xlu1 %671, %v161_v7   ;;  %v674_v53 = vld [vmem:[%s1033_s1] ss:$0 sm:$0xff] }
   0xb   :  { %629 = vmatmul.msk.f32.gmra.mxu0 %vm58_vm1, %v52_v5  ;;  %vm191_vm8 = vcmp.eq.s32.totalorder %v896_v52, %v674_v53  ;;  %vm192_vm9 = vcmp.eq.s32.totalorder %v188_v61, %v674_v53  ;;  %v281_v0 = vld [vmem:[%s1041_s9] sm:$0xff]  ;;  %v716_v5 = vmov 16.0  }
   0xc   :  { %166 = vperm.xlu0 %670, %v159_v6   ;;  %308 = vmatpush.msrb.mxu0 %v283_v43  ;;  %v905_v60 = vsel %vm191_vm8, 1.0, %v715_v22  ;;  %v911_v62 = vsel %vm192_vm9, 1.0, %v715_v22  ;;  %680 = vrcp.f32 %v716_v5  ;;  %v675_v7 = vld [vmem:[%s1042_s10] ss:$0 sm:$0xff] }
   0xe   :  { %309 = vmatpush.msrb.mxu0 %v282_v63 }
  0x10   :  { %632 = vmatmul.msk.f32.gmra.mxu1 %vm58_vm1, %v96_v10  ;;  %310 = vmatpush.msrb.mxu0 %v281_v0 }
  0x12   :  { %v681_v8 = vpop.eup %680 }
  0x13   :  { %v328_v10 = vmul.f32 16.0, %v681_v8  ;;  %vm332_vm10 = vweird.f32 %v681_v8 }
  0x18   :  { %633 = vmatmul.msk.f32.gmra.mxu1 %vm58_vm1, %v97_v12 }
  0x20   :  { %634 = vmatmul.msk.f32.gmra.mxu1 %vm58_vm1, %v98_v15 }
  0x74   :  { %v170_v27 = vpop.permute.xlu1 %169 }
  0x75   :  { %vm176_vm6 = vcmp.eq.s32.totalorder %v157_v19, %v170_v27 }
  0x76   :  { %v164_v20 = vpop.permute.xlu0 %163  ;;  %v864_v28 = vsel %vm176_vm6, 1.0, %v715_v22 }
  0x77   :  { %vm174_vm3 = vcmp.eq.s32.totalorder %v157_v19, %v164_v20 }
  0x78   :  { %v850_v23 = vsel %vm174_vm3, 1.0, %v715_v22 }
  0x7c   :  { %v173_v29 = vpop.permute.xlu1 %172 }
  0x7d   :  { %vm177_vm7 = vcmp.eq.s32.totalorder %v157_v19, %v173_v29 }
  0x7e   :  { %v167_v25 = vpop.permute.xlu0 %166  ;;  %v869_v30 = vsel %vm177_vm7, 1.0, %v715_v22 }
  0x7f   :  { %vm175_vm5 = vcmp.eq.s32.totalorder %v157_v19, %v167_v25 }
  0x80   :  { %v86_v13 = vpop.f32.mrf.mxu0  ;;  %v859_v26 = vsel %vm175_vm5, 1.0, %v715_v22 }
  0x81   :  { %v87_v14 = vadd.f32 %v672_v11, %v86_v13 }
  0x83   :  { %93 = vst.msk [vmem:[#allocation2] sm:$0xff] %vm92_vm2, %v87_v14 }
  0x85   :  { %v136_v32 = vpop.f32.mrf.mxu1 }
  0x86   :  { %v137_v33 = vadd.f32 %v673_v31, %v136_v32 }
  0x88   :  { %v89_v16 = vpop.f32.mrf.mxu0  ;;  %148 = vst.msk [vmem:[#allocation3] sm:$0xff] %vm92_vm2, %v137_v33 }
  0x89   :  { %v90_v18 = vadd.f32 %v672_v11, %v89_v16  ;;  %v329_v16 = vsub.f32 1.0, %v328_v10  ;;  %v658_v10 = vld [vmem:[%s1041_s9 + $0x30] sm:$0xff] }
  0x8a   :  { %v853_v24 = vld [vmem:[#allocation2] sm:$0xff] }
  0x8b   :  { %94 = vst.msk [vmem:[#allocation2 + $0x8] sm:$0xff] %vm92_vm2, %v90_v18  ;;  %v330_v29 = vmul.f32 %v681_v8, %v329_v16 }
  0x8d   :  { %v139_v34 = vpop.f32.mrf.mxu1 }
  0x8e   :  { %v140_v35 = vadd.f32 %v673_v31, %v139_v34 }
  0x8f   :  { %v894_v51 = vld [vmem:[#allocation3] sm:$0xff] }
  0x90   :  { %149 = vst.msk [vmem:[#allocation3 + $0x8] sm:$0xff] %vm92_vm2, %v140_v35  ;;  %v331_v35 = vadd.f32 %v681_v8, %v330_v29 }
  0x92   :  { %v847_v21 = vld [vmem:[#allocation2 + $0x8] sm:$0xff] }
  0x93   :  { %231 = vmatpush.msra.mxu2 %v847_v21 }
  0x95   :  { %232 = vmatpush.msra.mxu2 %v853_v24  ;;  %v142_v36 = vpop.f32.mrf.mxu1 }
  0x96   :  { %642 = vmatmul.msk.f32.vlgmr.msra.gmra.mxu2 %vm204_vm4, %v850_v23  ;;  %v143_v37 = vadd.f32 %v673_v31, %v142_v36 }
  0x97   :  { %v890_v47 = vld [vmem:[#allocation3 + $0x8] sm:$0xff] }
  0x98   :  { %150 = vst.msk [vmem:[#allocation3 + $0x10] sm:$0xff] %vm92_vm2, %v143_v37 }
  0x9d   :  { %v145_v38 = vpop.f32.mrf.mxu1 }
  0x9e   :  { %643 = vmatmul.msk.f32.gmra.mxu2 %vm204_vm4, %v859_v26  ;;  %v146_v39 = vadd.f32 %v673_v31, %v145_v38 }
  0x9f   :  { %v886_v45 = vld [vmem:[#allocation3 + $0x10] sm:$0xff] }
  0xa0   :  { %151 = vst.msk [vmem:[#allocation3 + $0x18] sm:$0xff] %vm92_vm2, %v146_v39 }
  0xa6   :  { %644 = vmatmul.msk.f32.gmra.mxu2 %vm204_vm4, %v864_v28 }
  0xa7   :  { %v888_v46 = vld [vmem:[#allocation3 + $0x18] sm:$0xff] }
  0xae   :  { %645 = vmatmul.msk.f32.gmra.mxu2 %vm204_vm4, %v869_v30 }
 0x119   :  { %v234_v40 = vpop.f32.mrf.mxu2 }
 0x11a   :  { %v235_v56 = vadd.f32 %v234_v40, %v894_v51  ;;  %v932_v40 = vsel %vm332_vm10, %v681_v8, %v331_v35 }
 0x11c   :  { %v246_v59 = vmax.f32 %v235_v56, 0.0 }
 0x121   :  { %v237_v41 = vpop.f32.mrf.mxu2 }
 0x122   :  { %v238_v54 = vadd.f32 %v237_v41, %v890_v47 }
 0x124   :  { %v247_v58 = vmax.f32 %v238_v54, 0.0 }
 0x129   :  { %v240_v44 = vpop.f32.mrf.mxu2 }
 0x12a   :  { %v241_v49 = vadd.f32 %v240_v44, %v886_v45 }
 0x12c   :  { %v248_v57 = vmax.f32 %v241_v49, 0.0 }
 0x131   :  { %v243_v48 = vpop.f32.mrf.mxu2 }
 0x132   :  { %v244_v50 = vadd.f32 %v243_v48, %v888_v46 }
 0x134   :  { %v249_v55 = vmax.f32 %v244_v50, 0.0 }
 0x136   :  { %268 = vmatpush.msra.mxu3 %v249_v55 }
 0x138   :  { %269 = vmatpush.msra.mxu3 %v248_v57 }
 0x13a   :  { %270 = vmatpush.msra.mxu3 %v247_v58 }
 0x13c   :  { %271 = vmatpush.msra.mxu3 %v246_v59 }
 0x13d   :  { %646 = vmatmul.msk.f32.vlgmr.msra.gmra.mxu3 %vm92_vm2, %v905_v60 }
 0x145   :  { %647 = vmatmul.msk.f32.gmra.mxu3 %vm92_vm2, %v911_v62 }
 0x1c0   :  { %v273_v1 = vpop.f32.mrf.mxu3 }
 0x1c1   :  { %v279_v2 = vadd.f32 %v273_v1, %v853_v24 }
 0x1c3   :  { %648 = vmatmul.msk.f32.vlgmr.msrb.gmra.mxu0 %vm92_vm2, %v279_v2 }
 0x1c8   :  { %v276_v3 = vpop.f32.mrf.mxu3 }
 0x1c9   :  { %v280_v4 = vadd.f32 %v276_v3, %v847_v21 }
 0x1cb   :  { %649 = vmatmul.msk.f32.gmra.mxu0 %vm92_vm2, %v280_v4 }
 0x240   :  { %v312_v6 = vpop.f32.mrf.mxu0 }
 0x241   :  { %v313_v9 = vadd.f32 %v675_v7, %v312_v6 }
 0x243   :  { %v335_v12 = vmul.f32 %v313_v9, %v313_v9  ;;  %v318_v14 = vsel %vm92_vm2, %v313_v9, 0.0 }
 0x245   :  { %v337_v19 = vsel %vm92_vm2, %v335_v12, 0.0 }
 0x248   :  { %v315_v11 = vpop.f32.mrf.mxu0 }
 0x249   :  { %v316_v13 = vadd.f32 %v675_v7, %v315_v11 }
 0x24b   :  { %v319_v15 = vsel %vm92_vm2, %v316_v13, 0.0  ;;  %v336_v17 = vmul.f32 %v316_v13, %v316_v13 }
 0x24c   :  { %v320_v18 = vadd.f32 %v319_v15, %v318_v14 }
 0x24d   :  { %v338_v20 = vsel %vm92_vm2, %v336_v17, 0.0 }
 0x24e   :  { %v321_v25 = vrot.slane %v320_v18, 4  ;;  %v339_v27 = vadd.f32 %v338_v20, %v337_v19 }
 0x250   :  { %v322_v31 = vadd.f32 %v321_v25, %v320_v18  ;;  %v340_v32 = vrot.slane %v339_v27, 4  ;;  %v676_v18 = vld [vmem:[%s1042_s10 + $0x1] ss:$0 sm:$0xff] }
 0x252   :  { %v323_v33 = vrot.slane %v322_v31, 2  ;;  %v341_v34 = vadd.f32 %v340_v32, %v339_v27 }
 0x254   :  { %v324_v36 = vadd.f32 %v323_v33, %v322_v31  ;;  %v342_v37 = vrot.slane %v341_v34, 2 }
 0x256   :  { %v325_v38 = vrot.slane %v324_v36, 1  ;;  %v343_v39 = vadd.f32 %v342_v37, %v341_v34 }
 0x258   :  { %v326_v41 = vadd.f32 %v325_v38, %v324_v36  ;;  %v344_v42 = vrot.slane %v343_v39, 1 }
 0x25a   :  { %v334_v43 = vmul.f32 %v932_v40, %v326_v41  ;;  %v345_v44 = vadd.f32 %v344_v42, %v343_v39 }
 0x25c   :  { %v346_v48 = vmul.f32 %v345_v44, %v932_v40  ;;  %v347_v49 = vmul.f32 %v334_v43, %v334_v43  ;;  %v349_v61 = vsub.f32 %v313_v9, %v334_v43  ;;  %v350_v63 = vsub.f32 %v316_v13, %v334_v43  ;;  %v659_v9 = vld [vmem:[%s1041_s9 + $0x38] sm:$0xff] }
 0x25d   :  { %458 = vmatpush.msrb.mxu1 %v659_v9 }
 0x25e   :  { %v348_v50 = vsub.f32 %v346_v48, %v347_v49 }
 0x25f   :  { %459 = vmatpush.msrb.mxu1 %v658_v10 }
 0x260   :  { %v351_v53 = vadd.f32 1e-05, %v348_v50 }
 0x262   :  { %682 = vrsqrt.f32 %v351_v53  ;;  %vm358_vm12 = vweird.f32 %v351_v53 }
 0x268   :  { %v683_v54 = vpop.eup %682 }
 0x269   :  { %v353_v55 = vmul.f32 %v683_v54, %v351_v53  ;;  %vm359_vm11 = vweird.f32 %v683_v54 }
 0x26a   :  { %vm360_vm13 = vmor %vm358_vm12, %vm359_vm11 }
 0x26b   :  { %v354_v56 = vmul.f32 %v683_v54, %v353_v55 }
 0x26d   :  { %v355_v57 = vmul.f32 0.5, %v354_v56 }
 0x26f   :  { %v356_v58 = vsub.f32 1.5, %v355_v57 }
 0x271   :  { %v357_v59 = vmul.f32 %v683_v54, %v356_v58 }
 0x273   :  { %v361_v0 = vsel %vm360_vm13, %v683_v54, %v357_v59 }
 0x274   :  { %v362_v1 = vmul.f32 %v361_v0, %v349_v61  ;;  %v363_v2 = vmul.f32 %v361_v0, %v350_v63  ;;  %v677_v61 = vld [vmem:[%s1034_s2] ss:$0 sm:$0xff] }
 0x275   :  { %vm199_vm14 = vcmp.eq.s32.totalorder %v896_v52, %v677_v61 }
 0x276   :  { %v364_v3 = vmax.f32 %v362_v1, 0.0  ;;  %v365_v4 = vmax.f32 %v363_v2, 0.0  ;;  %v641_v63 = vsel %vm199_vm14, 1.0, %v715_v22 }
 0x277   :  { %v540_v0 = vsel %vm539_vm15, %v641_v63, 0.0 }
 0x278   :  { %v366_v5 = vadd.f32 %v364_v3, %v853_v24  ;;  %v367_v6 = vadd.f32 %v365_v4, %v847_v21  ;;  %541 = vadd.xlane.f32.xlu2 %v540_v0 }
 0x27a   :  { %368 = vst.msk [vmem:[#allocation2] sm:$0xff] %vm92_vm2, %v366_v5 }
 0x27b   :  { %369 = vst.msk [vmem:[#allocation2 + $0x8] sm:$0xff] %vm92_vm2, %v367_v6 }
 0x281   :  { %v943_v8 = vld [vmem:[#allocation2] sm:$0xff] }
 0x282   :  { %v940_v7 = vld [vmem:[#allocation2 + $0x8] sm:$0xff] }
 0x283   :  { %386 = vmatpush.msrb.mxu3 %v940_v7 }
 0x285   :  { %387 = vmatpush.msrb.mxu3 %v943_v8 }
 0x286   :  { %650 = vmatmul.msk.f32.vlgmr.msrb.gmra.mxu3 %vm204_vm4, %v850_v23 }
 0x28e   :  { %651 = vmatmul.msk.f32.gmra.mxu3 %vm204_vm4, %v859_v26 }
 0x296   :  { %652 = vmatmul.msk.f32.gmra.mxu3 %vm204_vm4, %v864_v28 }
 0x29e   :  { %653 = vmatmul.msk.f32.gmra.mxu3 %vm204_vm4, %v869_v30 }
 0x309   :  { %v389_v21 = vpop.f32.mrf.mxu3 }
 0x30a   :  { %v390_v13 = vadd.f32 %v389_v21, %v894_v51 }
 0x30c   :  { %v401_v16 = vmax.f32 %v390_v13, 0.0  ;;  %v581_v13 = vld [vmem:[%s1045_s13 + $0x18] sm:$0xff] }
 0x311   :  { %v392_v24 = vpop.f32.mrf.mxu3 }
 0x312   :  { %v393_v30 = vadd.f32 %v392_v24, %v890_v47 }
 0x314   :  { %v402_v15 = vmax.f32 %v393_v30, 0.0  ;;  %v549_v30 = vld [vmem:[%s1043_s11 + $0x18] sm:$0xff] }
 0x319   :  { %v395_v23 = vpop.f32.mrf.mxu3 }
 0x31a   :  { %v396_v11 = vadd.f32 %v395_v23, %v886_v45  ;;  %v657_v45 = vld [vmem:[%s1041_s9 + $0x28] sm:$0xff] }
 0x31b   :  { %460 = vmatpush.msrb.mxu1 %v657_v45 }
 0x31c   :  { %v403_v14 = vmax.f32 %v396_v11, 0.0 }
 0x321   :  { %v398_v26 = vpop.f32.mrf.mxu3 }
 0x322   :  { %v399_v28 = vadd.f32 %v398_v26, %v888_v46  ;;  %v656_v46 = vld [vmem:[%s1041_s9 + $0x20] sm:$0xff] }
 0x323   :  { %461 = vmatpush.msrb.mxu1 %v656_v46 }
 0x324   :  { %v404_v12 = vmax.f32 %v399_v28, 0.0 }
 0x326   :  { %417 = vmatpush.msra.mxu0 %v404_v12  ;;  %v546_v12 = vld [vmem:[%s1043_s11] sm:$0xff] }
 0x328   :  { %418 = vmatpush.msra.mxu0 %v403_v14  ;;  %v580_v14 = vld [vmem:[%s1045_s13 + $0x10] sm:$0xff] }
 0x32a   :  { %419 = vmatpush.msra.mxu0 %v402_v15  ;;  %v579_v15 = vld [vmem:[%s1045_s13 + $0x8] sm:$0xff] }
 0x32c   :  { %420 = vmatpush.msra.mxu0 %v401_v16  ;;  %v542_v16 = vpop.xlane.xlu2 %541 }
 0x32d   :  { %654 = vmatmul.msk.f32.vlgmr.msra.gmra.mxu0 %vm92_vm2, %v905_v60  ;;  %v543_v45 = vmax.f32 %v542_v16, 1.0 }
 0x32e   :  { %601 = vmatpush.msrb.mxu0 %v581_v13 }
 0x330   :  { %602 = vmatpush.msrb.mxu0 %v580_v14 }
 0x332   :  { %603 = vmatpush.msrb.mxu0 %v579_v15 }
 0x335   :  { %655 = vmatmul.msk.f32.gmra.mxu0 %vm92_vm2, %v911_v62 }
 0x3aa   :  { %v422_v47 = vpop.f32.mrf.mxu0 }
 0x3ab   :  { %v428_v51 = vadd.f32 %v422_v47, %v943_v8 }
 0x3ad   :  { %661 = vmatmul.msk.f32.vlgmr.msrb.gmra.mxu1 %vm92_vm2, %v428_v51 }
 0x3b2   :  { %v425_v17 = vpop.f32.mrf.mxu0 }
 0x3b3   :  { %v429_v60 = vadd.f32 %v425_v17, %v940_v7  ;;  %v578_v17 = vld [vmem:[%s1045_s13] sm:$0xff]  ;;  %s618_s13 = sshll.u32 %s1047_s15, 4  ;;  %s619_s13 = int_to_ptr.hbm [resolvable:$true] %s618_s13 }
 0x3b4   :  { %604 = vmatpush.msrb.mxu0 %v578_v17 }
 0x3b5   :  { %662 = vmatmul.msk.f32.gmra.mxu1 %vm92_vm2, %v429_v60  ;;  %v678_v60 = vld [vmem:[%s1044_s12] ss:$0 sm:$0xff] }
 0x42a   :  { %v463_v62 = vpop.f32.mrf.mxu1 }
 0x42b   :  { %v464_v19 = vadd.f32 %v676_v18, %v463_v62 }
 0x42d   :  { %v479_v25 = vmul.f32 %v464_v19, %v464_v19  ;;  %v469_v29 = vsel %vm92_vm2, %v464_v19, 0.0 }
 0x42f   :  { %v481_v34 = vsel %vm92_vm2, %v479_v25, 0.0 }
 0x432   :  { %v466_v20 = vpop.f32.mrf.mxu1 }
 0x433   :  { %v467_v27 = vadd.f32 %v676_v18, %v466_v20  ;;  %v679_v20 = vld [vmem:[%s1046_s14] ss:$0 sm:$0xff] }
 0x435   :  { %v470_v31 = vsel %vm92_vm2, %v467_v27, 0.0  ;;  %v480_v32 = vmul.f32 %v467_v27, %v467_v27 }
 0x436   :  { %v471_v33 = vadd.f32 %v470_v31, %v469_v29 }
 0x437   :  { %v482_v35 = vsel %vm92_vm2, %v480_v32, 0.0 }
 0x438   :  { %v472_v36 = vrot.slane %v471_v33, 4  ;;  %v483_v37 = vadd.f32 %v482_v35, %v481_v34 }
 0x43a   :  { %v473_v38 = vadd.f32 %v472_v36, %v471_v33  ;;  %v484_v39 = vrot.slane %v483_v37, 4 }
 0x43c   :  { %v474_v41 = vrot.slane %v473_v38, 2  ;;  %v485_v42 = vadd.f32 %v484_v39, %v483_v37 }
 0x43e   :  { %v475_v43 = vadd.f32 %v474_v41, %v473_v38  ;;  %v486_v44 = vrot.slane %v485_v42, 2 }
 0x440   :  { %v476_v48 = vrot.slane %v475_v43, 1  ;;  %v487_v49 = vadd.f32 %v486_v44, %v485_v42 }
 0x442   :  { %v477_v50 = vadd.f32 %v476_v48, %v475_v43  ;;  %v488_v53 = vrot.slane %v487_v49, 1 }
 0x444   :  { %v478_v54 = vmul.f32 %v477_v50, %v932_v40  ;;  %v489_v55 = vadd.f32 %v488_v53, %v487_v49 }
 0x446   :  { %v490_v56 = vmul.f32 %v489_v55, %v932_v40  ;;  %v491_v57 = vmul.f32 %v478_v54, %v478_v54  ;;  %v493_v6 = vsub.f32 %v464_v19, %v478_v54  ;;  %v494_v21 = vsub.f32 %v467_v27, %v478_v54 }
 0x448   :  { %v492_v58 = vsub.f32 %v490_v56, %v491_v57 }
 0x44a   :  { %v495_v59 = vadd.f32 1e-05, %v492_v58 }
 0x44c   :  { %684 = vrsqrt.f32 %v495_v59  ;;  %vm502_vm1 = vweird.f32 %v495_v59 }
 0x44d   :  { %686 = vrcp.f32 %v543_v45 }
 0x452   :  { %v685_v1 = vpop.eup %684 }
 0x453   :  { %v497_v2 = vmul.f32 %v685_v1, %v495_v59  ;;  %vm503_vm0 = vweird.f32 %v685_v1  ;;  %v687_v46 = vpop.eup %686 }
 0x454   :  { %vm504_vm3 = vmor %vm502_vm1, %vm503_vm0 }
 0x455   :  { %v498_v3 = vmul.f32 %v685_v1, %v497_v2 }
 0x457   :  { %v499_v4 = vmul.f32 0.5, %v498_v3 }
 0x459   :  { %v500_v40 = vsub.f32 1.5, %v499_v4 }
 0x45b   :  { %v501_v5 = vmul.f32 %v685_v1, %v500_v40 }
 0x45d   :  { %v505_v24 = vsel %vm504_vm3, %v685_v1, %v501_v5 }
 0x45e   :  { %v506_v9 = vmul.f32 %v505_v24, %v493_v6  ;;  %v507_v10 = vmul.f32 %v505_v24, %v494_v21 }
 0x460   :  { %v508_v52 = vmax.f32 %v506_v9, 0.0  ;;  %v509_v23 = vmax.f32 %v507_v10, 0.0 }
 0x462   :  { %v510_v22 = vadd.f32 %v508_v52, %v943_v8  ;;  %v511_v26 = vadd.f32 %v509_v23, %v940_v7  ;;  %v548_v8 = vld [vmem:[%s1043_s11 + $0x10] sm:$0xff]  ;;  %v547_v7 = vld [vmem:[%s1043_s11 + $0x8] sm:$0xff] }
 0x464   :  { %512 = vst.msk [vmem:[#allocation2] sm:$0xff] %vm92_vm2, %v510_v22 }
 0x465   :  { %513 = vst.msk [vmem:[#allocation2 + $0x8] sm:$0xff] %vm92_vm2, %v511_v26 }
 0x46b   :  { %v514_v28 = vld [vmem:[#allocation2] sm:$0xff] }
 0x46c   :  { %v515_v11 = vld [vmem:[#allocation2 + $0x8] sm:$0xff] }
 0x46d   :  { %533 = vmatpush.msrb.mxu2 %v515_v11 }
 0x46f   :  { %534 = vmatpush.msrb.mxu2 %v514_v28 }
 0x470   :  { %663 = vmatmul.msk.f32.vlgmr.msrb.gmra.mxu2 %vm204_vm4, %v641_v63  ;;  %vm609_vm4 = vcmask 58368  }
 0x471   :  { %569 = vmatpush.msra.mxu2 %v549_v30 }
 0x473   :  { %570 = vmatpush.msra.mxu2 %v548_v8 }
 0x475   :  { %571 = vmatpush.msra.mxu2 %v547_v7 }
 0x477   :  { %572 = vmatpush.msra.mxu2 %v546_v12 }
 0x4f3   :  { %v536_v47 = vpop.f32.mrf.mxu2 }
 0x4f4   :  { %v545_v51 = vmul.f32 %v687_v46, %v536_v47 }
 0x4f6   :  { %664 = vmatmul.msk.f32.vlgmr.msra.gmra.mxu2 %vm92_vm2, %v545_v51 }
 0x579   :  { %v574_v62 = vpop.f32.mrf.mxu2 }
 0x57a   :  { %v575_v18 = vadd.f32 %v678_v60, %v574_v62 }
 0x57c   :  { %v577_v19 = vmax.f32 %v575_v18, 0.0 }
 0x57e   :  { %665 = vmatmul.msk.f32.vlgmr.msrb.gmra.mxu0 %vm92_vm2, %v577_v19 }
 0x5fb   :  { %v606_v25 = vpop.f32.mrf.mxu0 }
 0x5fc   :  { %v607_v27 = vadd.f32 %v679_v20, %v606_v25 }
 0x5fe   :  { %610 = vst.msk [vmem:[#allocation4] sm:$0x3] %vm609_vm4, %v607_v27 }
 0x5ff   :  { %621 = dma.vmem_to_hbm [thread:$0]  %s617_s7, 32, %s619_s13, [#allocation5]  }
 0x600   :  { %712 = dma.done.wait [#allocation5], 32  }
 0x601   :  { %713 = vsyncadd [#allocation5], 4294967264 }
 0x602   :  { %626 = vsyncpa [#allocation5], 1 }

</bundles_post_ra>
